<compile_context>
chip_gen: v5e
topology: v5e:2x2
jax: 0.10.0
libtpu: 0.0.40
codegen_flags: <defaults>
</compile_context>

<pallas_src>
import functools

import jax
import jax.numpy as jnp
from jax.experimental import pallas as pl
from jax.experimental.pallas import tpu as pltpu


STATE_BRANCH = 64      # stateFullyConnected output width (fixed by the module)
FC1_OUT = 128
FC2_OUT = 64
_BF16_SUBLANE = 16     # bf16 sublane packing granularity


def _round_up(x, m):
    return ((x + m - 1) // m) * m


def _stage0_rows(k0):
    """Sublane-aligned start row of the W1x/W2 block inside the weight slab."""
    return _round_up(k0, _BF16_SUBLANE)


# ----------------------------------------------------------------------------
# Kernel
# ----------------------------------------------------------------------------
def critic_kernel(sa_ref, w_ref, b_ref, out_ref, *, sd, ad, n_sub):
    k0 = sd + ad
    r1 = _stage0_rows(k0)

    # --- Weights (bf16, MXU operands): loaded once per tile, reused by all
    #     sub-blocks.  Static slices of the VMEM slab are cheap views.
    w0 = w_ref[0:k0, :]                  # (k0, 256): [.,0:128]=W1a rows (action),
    #                                      [.,128:192]=Ws rows (state), rest zero
    w1x = w_ref[r1:r1 + 128, 0:128]      # (128,128): rows 0:64 = W1x, rows 64:128 = 0
    w2 = w_ref[r1:r1 + 128, 128:192]     # (128, 64): fc2 weight (in, out)

    # --- Biases + fc3 row (f32, VPU operands).
    bs = b_ref[0:1, :]                   # (1,128): bs in lanes 0:64, zeros after
    b1 = b_ref[1:2, :]                   # (1,128)
    b2 = b_ref[2:3, 0:FC2_OUT]           # (1, 64)
    w3 = b_ref[3:4, 0:FC2_OUT]           # (1, 64) fc3 weight row (f32, used on VPU)
    b3 = b_ref[4:5, 0:1]                 # (1, 1)

    rows = out_ref.shape[0]
    sub = rows // n_sub
    for s in range(n_sub):               # static unroll: independent sub-chains
        rs = slice(s * sub, (s + 1) * sub)

        sa = sa_ref[rs, :]               # (sub, k0) bf16 = cat(state, action)

        # Stage 0 (fused): t[:,0:128] = action @ W1a ; t[:,128:192] = state @ Ws
        t = jnp.dot(sa, w0, preferred_element_type=jnp.float32)   # (sub, 256) f32

        # state branch: relu(state @ Ws + bs); padded lanes 64:128 stay zero.
        x = jnp.maximum(t[:, 128:256] + bs, 0.0)                  # (sub, 128) f32

        # fc1: relu(x @ W1x + action @ W1a + b1)
        h1 = jnp.dot(x.astype(jnp.bfloat16), w1x,
                     preferred_element_type=jnp.float32)
        h1 = jnp.maximum(h1 + t[:, 0:128] + b1, 0.0)              # (sub, 128) f32

        # fc2: relu(h1 @ W2 + b2)
        h2 = jnp.dot(h1.astype(jnp.bfloat16), w2,
                     preferred_element_type=jnp.float32)
        h2 = jnp.maximum(h2 + b2, 0.0)                            # (sub, 64) f32

        # fc3: output width 1 -> VPU multiply + XLU lane reduce (skip the MXU).
        q = jnp.sum(h2 * w3, axis=-1, keepdims=True) + b3         # (sub, 1) f32
        out_ref[rs, :] = q


# ----------------------------------------------------------------------------
# One-time weight prepacking (outside the per-call hot path)
# ----------------------------------------------------------------------------
def prepack_params(params):
    """Pack PyTorch-layout params into one bf16 weight slab + one f32 bias slab."""
    ws, bs, w1, b1, w2, b2, w3, b3 = params
    ws = jnp.asarray(ws); bs = jnp.asarray(bs)
    w1 = jnp.asarray(w1); b1 = jnp.asarray(b1)
    w2 = jnp.asarray(w2); b2 = jnp.asarray(b2)
    w3 = jnp.asarray(w3); b3 = jnp.asarray(b3)

    sd = ws.shape[1]
    ad = w1.shape[1] - STATE_BRANCH
    k0 = sd + ad
    r1 = _stage0_rows(k0)

    w1_t = w1.T                                   # (64+ad, 128)
    w1x = w1_t[:STATE_BRANCH, :]                  # (64, 128)
    w1a = w1_t[STATE_BRANCH:, :]                  # (ad, 128)

    # bf16 weight slab: (r1 + 128, 256)
    wslab = jnp.zeros((r1 + 128, 256), jnp.float32)
    wslab = wslab.at[0:sd, 128:128 + STATE_BRANCH].set(ws.T)      # Ws^T
    wslab = wslab.at[sd:k0, 0:128].set(w1a)                       # W1a
    wslab = wslab.at[r1:r1 + STATE_BRANCH, 0:128].set(w1x)        # W1x (rows 64:128 = 0)
    wslab = wslab.at[r1:r1 + 128, 128:128 + FC2_OUT].set(w2.T)    # W2^T
    wslab = wslab.astype(jnp.bfloat16)

    # f32 bias / fc3-row slab: (8, 128)
    bslab = jnp.zeros((8, 128), jnp.float32)
    bslab = bslab.at[0, 0:STATE_BRANCH].set(bs)
    bslab = bslab.at[1, 0:FC1_OUT].set(b1)
    bslab = bslab.at[2, 0:FC2_OUT].set(b2)
    bslab = bslab.at[3, 0:FC2_OUT].set(w3.reshape(-1))
    bslab = bslab.at[4, 0:1].set(b3.reshape(-1))
    return wslab, bslab


# ----------------------------------------------------------------------------
# Wrapper: batch-tiled pallas_call
# ----------------------------------------------------------------------------
def _tiled_map(i):          # batch-tiled operands: block (i, 0)
    return (i, 0)


def _const_map(i):          # VMEM-resident weight/bias slabs: always block (0, 0)
    return (0, 0)


@functools.partial(jax.jit, static_argnames=("tile_b", "vmem_limit_bytes"))
def critic_forward(state, action, packed, *, tile_b=2048,
                   vmem_limit_bytes=32 * 1024 * 1024):
    """state: (B, stateDim) f32, action: (B, actionDim) f32 -> (B, 1) f32."""
    wslab, bslab = packed
    B, sd = state.shape
    ad = action.shape[1]
    k0 = sd + ad

    # --- Batch tile selection: tb is always a multiple of 8; when B >= 16 we
    #     force >= 2 grid steps so both v7x TensorCores get work (no effect on
    #     v5e/v6e, which have one TC).  Padded rows compute on zeros and are
    #     sliced off (rows are independent, so valid rows are exact).
    if B <= 8:
        tb = 8
    else:
        n_tiles = max(1, -(-B // int(tile_b)))
        if B >= 16:
            n_tiles = max(n_tiles, 2)
        tb = _round_up(-(-B // n_tiles), 8)
    pad = (-B) % tb
    Bp = B + pad
    grid = (Bp // tb,)

    # Split each tile into 2 independent row sub-blocks so MXU and VPU/XLU
    # work from different sub-blocks can overlap.
    n_sub = 2 if (tb % 16 == 0 and tb >= 64) else 1

    # Single fused input stream: cat(state, action), padded, cast to bf16
    # (halves the input DMA bytes; matmul accumulation stays f32).
    sa = jnp.concatenate([state, action], axis=1)
    if pad:
        sa = jnp.pad(sa, ((0, pad), (0, 0)))
    sa = sa.astype(jnp.bfloat16)

    kernel = functools.partial(critic_kernel, sd=sd, ad=ad, n_sub=n_sub)

    in_specs = [
        pl.BlockSpec((tb, k0), _tiled_map),
        pl.BlockSpec(wslab.shape, _const_map),
        pl.BlockSpec(bslab.shape, _const_map),
    ]
    out_spec = pl.BlockSpec((tb, 1), _tiled_map)

    # Advisory cost hint for the XLA scheduler.
    flops_per_row = 2 * (k0 * 256 + 128 * 128 + 128 * FC2_OUT + FC2_OUT)
    cost = pl.CostEstimate(
        flops=int(Bp * flops_per_row),
        transcendentals=0,
        bytes_accessed=int(2 * Bp * k0 + 4 * Bp
                           + 2 * wslab.size + 4 * bslab.size),
    )

    out = pl.pallas_call(
        kernel,
        out_shape=jax.ShapeDtypeStruct((Bp, 1), jnp.float32),
        grid=grid,
        in_specs=in_specs,
        out_specs=out_spec,
        compiler_params=pltpu.CompilerParams(
            dimension_semantics=("parallel",),
            # 32 MiB fits the v7x scoped default as well as v5e/v6e; at the
            # default tile (2048 rows, ~2.5 MB of live activations per
            # sub-block) this leaves ample headroom on all generations.
            vmem_limit_bytes=vmem_limit_bytes,
        ),
        cost_estimate=cost,
    )(sa, wslab, bslab)

    return out[:B] if pad else out


# ----------------------------------------------------------------------------
# Init + pure-JAX reference
# ----------------------------------------------------------------------------
def init_params(key, state_dim, action_dim):
    """Deterministic init mimicking PyTorch Linear's U(-1/sqrt(fan_in), ...)."""
    def linear(key, out_f, in_f):
        kw, kb = jax.random.split(key)
        bound = 1.0 / jnp.sqrt(in_f)
        w = jax.random.uniform(kw, (out_f, in_f), jnp.float32, -bound, bound)
        b = jax.random.uniform(kb, (out_f,), jnp.float32, -bound, bound)
        return w, b

    k0, k1, k2, k3 = jax.random.split(key, 4)
    ws, bs = linear(k0, STATE_BRANCH, state_dim)                 # stateFullyConnected
    w1, b1 = linear(k1, FC1_OUT, STATE_BRANCH + action_dim)      # fc1
    w2, b2 = linear(k2, FC2_OUT, FC1_OUT)                        # fc2
    w3, b3 = linear(k3, 1, FC2_OUT)                              # fc3
    return (ws, bs, w1, b1, w2, b2, w3, b3)


def reference_forward(state, action, params):
    """Pure-JAX f32 reference matching the PyTorch forward exactly."""
    (ws, bs, w1, b1, w2, b2, w3, b3) = params
    x = jnp.maximum(state @ ws.T + bs, 0.0)
    x = jnp.concatenate([x, action], axis=1)
    x = jnp.maximum(x @ w1.T + b1, 0.0)
    x = jnp.maximum(x @ w2.T + b2, 0.0)
    return x @ w3.T + b3


# ----------------------------------------------------------------------------
# Main
# ----------------------------------------------------------------------------
if __name__ == "__main__":
    STATE_DIM = 8
    ACTION_DIM = 4
    BATCH = 2

    key = jax.random.PRNGKey(0)
    k_params, k_state, k_action = jax.random.split(key, 3)

    params = init_params(k_params, STATE_DIM, ACTION_DIM)
    packed = prepack_params(params)   # one-time prepack, outside the hot path

    # Small case (single grid point, minimal 8-row padded tile).
    state = jax.random.normal(k_state, (BATCH, STATE_DIM), jnp.float32)
    action = jax.random.normal(k_action, (BATCH, ACTION_DIM), jnp.float32)

    out = jax.block_until_ready(critic_forward(state, action, packed))
    ref = reference_forward(state, action, params)
    assert out.shape == (BATCH, 1)
    # bf16 MXU operands -> loosened tolerance vs. the f32 reference.
    assert jnp.allclose(out, ref, atol=5e-2, rtol=5e-2), (out, ref)

    # Larger case: exercises padding, >=2 grid steps, and per-tile sub-blocking.
    BIG = 600
    ks2, ka2 = jax.random.split(jax.random.PRNGKey(1))
    state2 = jax.random.normal(ks2, (BIG, STATE_DIM), jnp.float32)
    action2 = jax.random.normal(ka2, (BIG, ACTION_DIM), jnp.float32)
    out2 = jax.block_until_ready(critic_forward(state2, action2, packed))
    ref2 = reference_forward(state2, action2, params)
    assert out2.shape == (BIG, 1)
    assert jnp.allclose(out2, ref2, atol=5e-2, rtol=5e-2)

    print("KERNEL_OK")
</pallas_src>

<mosaic_0001>
module attributes {stable_mosaic.version = 11 : i64} {
  func.func @critic_kernel(%arg0: i32, %arg1: memref<8x12xbf16, #tpu.memory_space<vmem>>, %arg2: memref<144x256xbf16, #tpu.memory_space<vmem>>, %arg3: memref<8x128xf32, #tpu.memory_space<vmem>>, %arg4: memref<8x1xf32, #tpu.memory_space<vmem>>) attributes {dimension_semantics = [#tpu.dimension_semantics<parallel>], iteration_bounds = array<i64: 1>, scalar_prefetch = 0 : i64, scratch_operands = 0 : i64, tpu.core_type = #tpu.core_type<tc>, window_params = [{transform_indices = @transform_0, window_bounds = array<i64: 8, 12>}, {pipeline_mode = #tpu.pipeline_mode<synchronous>, transform_indices = @transform_1, window_bounds = array<i64: 144, 256>}, {pipeline_mode = #tpu.pipeline_mode<synchronous>, transform_indices = @transform_2, window_bounds = array<i64: 8, 128>}, {transform_indices = @transform_3, window_bounds = array<i64: 8, 1>}]} {
    %c0 = arith.constant 0 : index
    %c0_0 = arith.constant 0 : index
    %0 = vector.load %arg2[%c0, %c0_0] : memref<144x256xbf16, #tpu.memory_space<vmem>>, vector<12x256xbf16>
    %c16 = arith.constant 16 : index
    %c0_1 = arith.constant 0 : index
    %1 = vector.load %arg2[%c16, %c0_1] : memref<144x256xbf16, #tpu.memory_space<vmem>>, vector<128x128xbf16>
    %c16_2 = arith.constant 16 : index
    %c128 = arith.constant 128 : index
    %2 = vector.load %arg2[%c16_2, %c128] : memref<144x256xbf16, #tpu.memory_space<vmem>>, vector<128x64xbf16>
    %c0_3 = arith.constant 0 : index
    %c0_4 = arith.constant 0 : index
    %3 = vector.load %arg3[%c0_3, %c0_4] : memref<8x128xf32, #tpu.memory_space<vmem>>, vector<1x128xf32>
    %c1 = arith.constant 1 : index
    %c0_5 = arith.constant 0 : index
    %4 = vector.load %arg3[%c1, %c0_5] : memref<8x128xf32, #tpu.memory_space<vmem>>, vector<1x128xf32>
    %c2 = arith.constant 2 : index
    %c0_6 = arith.constant 0 : index
    %5 = vector.load %arg3[%c2, %c0_6] : memref<8x128xf32, #tpu.memory_space<vmem>>, vector<1x64xf32>
    %c3 = arith.constant 3 : index
    %c0_7 = arith.constant 0 : index
    %6 = vector.load %arg3[%c3, %c0_7] : memref<8x128xf32, #tpu.memory_space<vmem>>, vector<1x64xf32>
    %c4 = arith.constant 4 : index
    %c0_8 = arith.constant 0 : index
    %7 = vector.load %arg3[%c4, %c0_8] : memref<8x128xf32, #tpu.memory_space<vmem>>, vector<1x1xf32>
    %c0_9 = arith.constant 0 : index
    %c0_10 = arith.constant 0 : index
    %8 = vector.load %arg1[%c0_9, %c0_10] : memref<8x12xbf16, #tpu.memory_space<vmem>>, vector<8x12xbf16>
    %cst = arith.constant dense<0.000000e+00> : vector<8x256xf32>
    %9 = tpu.matmul %8, %0, %cst {dimension_numbers = #tpu.dot_dimension_numbers<[1], [0], [0], [1], [0, 0, 1, 1], [], []>} : vector<8x12xbf16>, vector<12x256xbf16>, vector<8x256xf32> -> vector<8x256xf32>
    %10 = vector.extract_strided_slice %9 {offsets = [0, 128], sizes = [8, 128], strides = [1, 1]} : vector<8x256xf32> to vector<8x128xf32>
    %11 = vector.broadcast %3 : vector<1x128xf32> to vector<8x128xf32>
    %12 = arith.addf %10, %11 : vector<8x128xf32>
    %cst_11 = arith.constant 0.000000e+00 : f32
    %13 = vector.broadcast %cst_11 : f32 to vector<8x128xf32>
    %14 = arith.maximumf %12, %13 : vector<8x128xf32>
    %15 = arith.truncf %14 : vector<8x128xf32> to vector<8x128xbf16>
    %cst_12 = arith.constant dense<0.000000e+00> : vector<8x128xf32>
    %16 = tpu.matmul %15, %1, %cst_12 {dimension_numbers = #tpu.dot_dimension_numbers<[1], [0], [0], [1], [0, 0, 1, 1], [], []>} : vector<8x128xbf16>, vector<128x128xbf16>, vector<8x128xf32> -> vector<8x128xf32>
    %17 = vector.extract_strided_slice %9 {offsets = [0, 0], sizes = [8, 128], strides = [1, 1]} : vector<8x256xf32> to vector<8x128xf32>
    %18 = arith.addf %16, %17 : vector<8x128xf32>
    %19 = vector.broadcast %4 : vector<1x128xf32> to vector<8x128xf32>
    %20 = arith.addf %18, %19 : vector<8x128xf32>
    %cst_13 = arith.constant 0.000000e+00 : f32
    %21 = vector.broadcast %cst_13 : f32 to vector<8x128xf32>
    %22 = arith.maximumf %20, %21 : vector<8x128xf32>
    %23 = arith.truncf %22 : vector<8x128xf32> to vector<8x128xbf16>
    %cst_14 = arith.constant dense<0.000000e+00> : vector<8x64xf32>
    %24 = tpu.matmul %23, %2, %cst_14 {dimension_numbers = #tpu.dot_dimension_numbers<[1], [0], [0], [1], [0, 0, 1, 1], [], []>} : vector<8x128xbf16>, vector<128x64xbf16>, vector<8x64xf32> -> vector<8x64xf32>
    %25 = vector.broadcast %5 : vector<1x64xf32> to vector<8x64xf32>
    %26 = arith.addf %24, %25 : vector<8x64xf32>
    %cst_15 = arith.constant 0.000000e+00 : f32
    %27 = vector.broadcast %cst_15 : f32 to vector<8x64xf32>
    %28 = arith.maximumf %26, %27 : vector<8x64xf32>
    %29 = vector.broadcast %6 : vector<1x64xf32> to vector<8x64xf32>
    %30 = arith.mulf %28, %29 : vector<8x64xf32>
    %cst_16 = arith.constant dense<0.000000e+00> : vector<8xf32>
    %31 = vector.multi_reduction <add>, %30, %cst_16 [1] : vector<8x64xf32> to vector<8xf32>
    %32 = vector.shape_cast %31 : vector<8xf32> to vector<8x1xf32>
    %33 = vector.broadcast %7 : vector<1x1xf32> to vector<8x1xf32>
    %34 = arith.addf %32, %33 : vector<8x1xf32>
    %c0_17 = arith.constant 0 : index
    %c0_18 = arith.constant 0 : index
    %35 = vector.load %arg4[%c0_17, %c0_18] : memref<8x1xf32, #tpu.memory_space<vmem>>, vector<8x1xf32>
    tpu.vector_store %arg4[%c0_17, %c0_18], %34 {strides = array<i32>} : memref<8x1xf32, #tpu.memory_space<vmem>>, vector<8x1xf32>,
    return
  }
  func.func @transform_0(%arg0: i32) -> (i32, i32) {
    %c0_i32 = arith.constant 0 : i32
    %c0_i32_0 = arith.constant 0 : i32
    return %arg0, %c0_i32 : i32, i32
  }
  func.func @transform_1(%arg0: i32) -> (i32, i32) {
    %c0_i32 = arith.constant 0 : i32
    %c0_i32_0 = arith.constant 0 : i32
    %c0_i32_1 = arith.constant 0 : i32
    return %c0_i32, %c0_i32_0 : i32, i32
  }
  func.func @transform_2(%arg0: i32) -> (i32, i32) {
    %c0_i32 = arith.constant 0 : i32
    %c0_i32_0 = arith.constant 0 : i32
    %c0_i32_1 = arith.constant 0 : i32
    return %c0_i32, %c0_i32_0 : i32, i32
  }
  func.func @transform_3(%arg0: i32) -> (i32, i32) {
    %c0_i32 = arith.constant 0 : i32
    %c0_i32_0 = arith.constant 0 : i32
    return %arg0, %c0_i32 : i32, i32
  }
}

</mosaic_0001>

<bundles_post_ra>
// kernel: critic_forward.1
= control target key start
LH: loop header
LB: loop body
LE: loop exit
PB: predicated region body
PF: predicated region fallthrough
CT: control target
= control target key end

     0   :  { %8 = vsyncpa [#allocation3], 0  ;;  %s389_s15 = smov [#allocation2]   ;;  %s390_s17 = smov 128   ;;  %s440_s0 = inlined_call_operand.vmem [shape: bf16[8,12], index: 0, kind: input, shape index: {}]   ;;  %s441_s1 = inlined_call_operand.hbm [shape: bf16[144,256], index: 1, kind: input, shape index: {}]   ;;  %s442_s2 = inlined_call_operand.vmem [shape: f32[8,128], index: 2, kind: input, shape index: {}]   ;;  %s443_s3 = inlined_call_operand.vmem [shape: f32[8,1], index: 3, kind: output, shape index: {}]  }
   0x1   :  { %s15_s14 = sshll.u32 %s441_s1, 4  ;;  %s17_s16 = sshll.u32 %s389_s15, 4  ;;  %s16_s14 = int_to_ptr.hbm [resolvable:$true] %s15_s14  ;;  %s18_s16 = int_to_ptr.vmem [resolvable:$true] %s17_s16 }
   0x2   :  { %s391_s18 = smov 8  }
   0x3   :  { %23 = dma.hbm_to_vmem [thread:$0]  %s16_s14, 2304, %s18_s16, [#allocation3], %s390_s17, %s390_s17, %s391_s18  }
   0x4   :  { %387 = dma.done.wait [#allocation3], 2304  }
   0x5   :  { %388 = vsyncadd [#allocation3], 4294964992  ;;  %v337_v0 = vld [vmem:[#allocation2 + $0x4] sm:$0xf]  ;;  %v267_v1 = vld [vmem:[#allocation2 + $0x8] sm:$0x30] }
   0x6   :  { %vm83_vm0 = vcmask 1045504   ;;  %v270_v2 = vor.u32 %v337_v0, %v267_v1  ;;  %v303_v3 = vld [vmem:[#allocation2 + $0x80] sm:$0xf]  ;;  %v346_v4 = vld [vmem:[#allocation2 + $0x84] sm:$0xf0]  ;;  %vm79_vm1 = vcmask 97280  }
   0x7   :  { %v299_v5 = vld [vmem:[#allocation2 + $0x70] sm:$0xf]  ;;  %v304_v6 = vor.u32 %v346_v4, %v303_v3  ;;  %v345_v7 = vld [vmem:[#allocation2 + $0x74] sm:$0xf0]  ;;  %v295_v11 = vld [vmem:[#allocation2 + $0x60] sm:$0xf] }
   0x8   :  { %v88_v8 = vsel %vm83_vm0, %v270_v2, 0  ;;  %v70_v9 = vld [vmem:[%s440_s0] sm:$0xf]  ;;  %v300_v10 = vor.u32 %v345_v7, %v299_v5  ;;  %v344_v12 = vld [vmem:[#allocation2 + $0x64] sm:$0xf0]  ;;  %vm250_vm2 = vcmask 523264  }
   0x9   :  { %110 = vmatpush.bf16.msra.mxu1 %v88_v8  ;;  %168 = vmatpush.bf16.msra.mxu2 %v304_v6  ;;  %v296_v13 = vor.u32 %v344_v12, %v295_v11  ;;  %v291_v14 = vld [vmem:[#allocation2 + $0x50] sm:$0xf]  ;;  %v343_v15 = vld [vmem:[#allocation2 + $0x54] sm:$0xf0]  ;;  %v287_v17 = vld [vmem:[#allocation2 + $0x40] sm:$0xf] }
   0xa   :  { %v292_v16 = vor.u32 %v343_v15, %v291_v14  ;;  %v342_v18 = vld [vmem:[#allocation2 + $0x44] sm:$0xf0]  ;;  %v283_v20 = vld [vmem:[#allocation2 + $0x30] sm:$0xf]  ;;  %v341_v21 = vld [vmem:[#allocation2 + $0x34] sm:$0xf0] }
   0xb   :  { %v288_v19 = vor.u32 %v342_v18, %v287_v17  ;;  %v284_v22 = vor.u32 %v341_v21, %v283_v20  ;;  %v279_v23 = vld [vmem:[#allocation2 + $0x20] sm:$0xf]  ;;  %v340_v24 = vld [vmem:[#allocation2 + $0x24] sm:$0xf0]  ;;  %v275_v30 = vld [vmem:[#allocation2 + $0x10] sm:$0xf] }
   0xc   :  { %272 = vmatmul.msk.bf16.vlgmr.msra.gmra.mxu1 %vm79_vm1, %v70_v9  ;;  %v280_v25 = vor.u32 %v340_v24, %v279_v23  ;;  %v265_v26 = vld [vmem:[#allocation2] sm:$0xf]  ;;  %v338_v27 = vld [vmem:[#allocation2 + $0x4] sm:$0x30]  ;;  %v339_v31 = vld [vmem:[#allocation2 + $0x14] sm:$0xf0] }
   0xd   :  { %169 = vmatpush.bf16.msra.mxu2 %v300_v10  ;;  %v266_v28 = vor.u32 %v338_v27, %v265_v26  ;;  %v276_v32 = vor.u32 %v339_v31, %v275_v30  ;;  %v335_v33 = vld [vmem:[#allocation2 + $0x84] sm:$0xf]  ;;  %v354_v34 = vld [vmem:[#allocation2 + $0x88] sm:$0xf0]  ;;  %v331_v35 = vld [vmem:[#allocation2 + $0x74] sm:$0xf] }
   0xe   :  { %v336_v36 = vor.u32 %v354_v34, %v335_v33  ;;  %v353_v37 = vld [vmem:[#allocation2 + $0x78] sm:$0xf0]  ;;  %v327_v39 = vld [vmem:[#allocation2 + $0x64] sm:$0xf]  ;;  %v352_v40 = vld [vmem:[#allocation2 + $0x68] sm:$0xf0] }
   0xf   :  { %v85_v29 = vsel %vm83_vm0, %v266_v28, 0  ;;  %v332_v38 = vor.u32 %v353_v37, %v331_v35  ;;  %v328_v41 = vor.u32 %v352_v40, %v327_v39  ;;  %v323_v42 = vld [vmem:[#allocation2 + $0x54] sm:$0xf]  ;;  %v351_v43 = vld [vmem:[#allocation2 + $0x58] sm:$0xf0]  ;;  %vm256_vm3 = vcmask 7168  }
  0x10   :  { %97 = vmatpush.bf16.msra.mxu0 %v85_v29  ;;  %234 = vmatpush.bf16.msra.mxu3 %v336_v36  ;;  %v324_v44 = vor.u32 %v351_v43, %v323_v42  ;;  %v358_v45 = vld [vmem:[%s442_s2] ss:$0 sm:$0xff]  ;;  %v319_v51 = vld [vmem:[#allocation2 + $0x44] sm:$0xf]  ;;  %v350_v52 = vld [vmem:[#allocation2 + $0x48] sm:$0xf0] }
  0x11   :  { %170 = vmatpush.bf16.msra.mxu2 %v296_v13  ;;  %v315_v53 = vld [vmem:[#allocation2 + $0x34] sm:$0xf]  ;;  %v320_v54 = vor.u32 %v350_v52, %v319_v51  ;;  %v349_v55 = vld [vmem:[#allocation2 + $0x38] sm:$0xf0]  ;;  %v311_v58 = vld [vmem:[#allocation2 + $0x24] sm:$0xf] }
  0x12   :  { %v316_v56 = vor.u32 %v349_v55, %v315_v53  ;;  %v348_v59 = vld [vmem:[#allocation2 + $0x28] sm:$0xf0]  ;;  %v307_v62 = vld [vmem:[#allocation2 + $0x14] sm:$0xf]  ;;  %v347_v63 = vld [vmem:[#allocation2 + $0x18] sm:$0xf0] }
  0x13   :  { %271 = vmatmul.msk.bf16.vlgmr.msra.gmra.mxu0 %vm79_vm1, %v70_v9  ;;  %v312_v61 = vor.u32 %v348_v59, %v311_v58  ;;  %v308_v0 = vor.u32 %v347_v63, %v307_v62  ;;  %v359_v1 = vld [vmem:[%s442_s2 + $0x1] ss:$0 sm:$0xff]  ;;  %v360_v8 = vld [vmem:[%s442_s2 + $0x2] ss:$0 sm:$0xff]  ;;  %v361_v11 = vld [vmem:[%s442_s2 + $0x3] ss:$0 sm:$0xff] }
  0x14   :  { %235 = vmatpush.bf16.msra.mxu3 %v332_v38 }
  0x15   :  { %171 = vmatpush.bf16.msra.mxu2 %v292_v16  ;;  %v362_v16 = vld [vmem:[%s442_s2 + $0x4] ss:$0 sm:$0xff] }
  0x18   :  { %236 = vmatpush.bf16.msra.mxu3 %v328_v41 }
  0x19   :  { %172 = vmatpush.bf16.msra.mxu2 %v288_v19 }
  0x1c   :  { %237 = vmatpush.bf16.msra.mxu3 %v324_v44 }
  0x1d   :  { %173 = vmatpush.bf16.msra.mxu2 %v284_v22 }
  0x20   :  { %238 = vmatpush.bf16.msra.mxu3 %v320_v54 }
  0x21   :  { %174 = vmatpush.bf16.msra.mxu2 %v280_v25 }
  0x24   :  { %239 = vmatpush.bf16.msra.mxu3 %v316_v56 }
  0x25   :  { %175 = vmatpush.bf16.msra.mxu2 %v276_v32 }
  0x28   :  { %240 = vmatpush.bf16.msra.mxu3 %v312_v61 }
  0x2c   :  { %241 = vmatpush.bf16.msra.mxu3 %v308_v0 }
  0x89   :  { %v112_v46 = vpop.f32.mrf.mxu1 }
  0x8a   :  { %v117_v47 = vadd.f32 %v358_v45, %v112_v46 }
  0x8c   :  { %v118_v48 = vmax.f32 %v117_v47, 0.0 }
  0x8e   :  { %v119_v49 = vpack.c.bf16 %v118_v48, %v118_v48 }
  0x90   :  { %176 = vmatmul.bf16.vlgmr.msra.gmra.mxu2 %v119_v49  ;;  %v99_v57 = vpop.f32.mrf.mxu0 }
  0x91   :  { %v114_v50 = vpop.f32.mrf.mxu1 }
  0x98   :  { %v101_v60 = vpop.f32.mrf.mxu0 }
 0x113   :  { %v177_v2 = vpop.f32.mrf.mxu2 }
 0x114   :  { %v178_v3 = vadd.f32 %v177_v2, %v99_v57 }
 0x116   :  { %v182_v4 = vadd.f32 %v359_v1, %v178_v3 }
 0x118   :  { %v183_v5 = vmax.f32 %v182_v4, 0.0 }
 0x11a   :  { %v184_v6 = vpack.c.bf16 %v183_v5, %v183_v5 }
 0x11b   :  { %v179_v7 = vpop.f32.mrf.mxu2 }
 0x11c   :  { %242 = vmatmul.bf16.vlgmr.msra.gmra.mxu3 %v184_v6 }
 0x19f   :  { %v243_v9 = vpop.f32.mrf.mxu3 }
 0x1a0   :  { %v244_v10 = vadd.f32 %v360_v8, %v243_v9 }
 0x1a2   :  { %v247_v12 = vmax.f32 %v244_v10, 0.0 }
 0x1a4   :  { %v249_v13 = vmul.f32 %v361_v11, %v247_v12 }
 0x1a6   :  { %v251_v14 = vsel %vm250_vm2, %v249_v13, 0.0 }
 0x1a7   :  { %v245_v15 = vpop.f32.mrf.mxu3  ;;  %252 = vadd.xlane.f32.xlu0 %v251_v14 }
 0x21a   :  { %v253_v17 = vpop.xlane.xlu0 %252 }
 0x21b   :  { %v255_v18 = vadd.f32 %v362_v16, %v253_v17 }
 0x21d   :  { %257 = vst.msk [vmem:[%s443_s3] sm:$0xff] %vm256_vm3, %v255_v18 }
 0x21e   :  { %262 = vsyncpa [#allocation3], 1 }

</bundles_post_ra>
